<compile_context>
chip_gen: v6e
topology: v6e:2x2x1
jax: 0.10.0
libtpu: 0.0.40
codegen_flags: <defaults>
</compile_context>

<pallas_src>
import jax
import jax.numpy as jnp
from jax.experimental import pallas as pl
from jax.experimental.pallas import tpu as pltpu


def _round_up(v, m):
    return ((v + m - 1) // m) * m


def _cdiv(a, b):
    return -(-a // b)


# ---------------------------------------------------------------------------
# Tile selection (balanced; minimal zero-padding, then fewest tiles).
# ---------------------------------------------------------------------------
def _pick_tile_kn(dim, cap):
    """Pick (tile, padded_dim) for a K/N-like dim (128/256-aligned when tiled)."""
    if dim <= cap:
        return dim, dim                       # single full-dim tile, no padding
    nt0 = _cdiv(dim, cap)
    cands = {128, 256,
             _round_up(_cdiv(dim, nt0), 128),
             _round_up(_cdiv(dim, nt0), 256)}

    def score(t):
        padded = _round_up(dim, t)
        waste8 = (padded - dim) * 8 // dim    # padding fraction in 1/8 buckets
        return (waste8, padded // t, padded, -t)

    t = min(cands, key=score)
    return t, _round_up(dim, t)


def _pick_tile_m(dim, cap, align):
    """Pick (tile, padded_dim) for the M dim (8/16-aligned when tiled)."""
    if dim <= cap:
        return dim, dim
    t = _round_up(_cdiv(dim, _cdiv(dim, cap)), align)
    return t, _round_up(dim, t)


# ---------------------------------------------------------------------------
# Path 1: tiny blocks & short M -> one lane-dense block-diagonal matmul.
# ---------------------------------------------------------------------------
def _fused_kernel_bias(x_ref, w_ref, b_ref, o_ref):
    acc = jnp.dot(x_ref[...], w_ref[...], preferred_element_type=jnp.float32)
    o_ref[...] = (acc + b_ref[...].astype(jnp.float32)).astype(o_ref.dtype)


def _fused_kernel_nobias(x_ref, w_ref, o_ref):
    o_ref[...] = jnp.dot(x_ref[...], w_ref[...],
                         preferred_element_type=jnp.float32).astype(o_ref.dtype)


def _block_linear_fused(x, weight, bias):
    nb, M, K = x.shape
    N = weight.shape[2]
    BK, BN = nb * K, nb * N
    out_dtype = jnp.result_type(x.dtype, weight.dtype)

    # (nb, M, K) -> (M, nb*K): block b occupies columns [b*K, (b+1)*K).
    x2 = jnp.transpose(x, (1, 0, 2)).reshape(M, BK)
    # Block-diagonal weight (BK, BN) via a single diagonal scatter (no
    # (nb, nb, K, N) eye outer-product intermediate).
    idx = jnp.arange(nb)
    w_bd = jnp.zeros((nb, K, nb, N), weight.dtype).at[idx, :, idx, :].set(weight)
    w_bd = w_bd.reshape(BK, BN)

    out_shape = jax.ShapeDtypeStruct((M, BN), out_dtype)
    if bias is not None:
        out2 = pl.pallas_call(_fused_kernel_bias, out_shape=out_shape)(
            x2, w_bd, bias.reshape(1, BN))
    else:
        out2 = pl.pallas_call(_fused_kernel_nobias, out_shape=out_shape)(x2, w_bd)

    # (M, nb*N) -> (nb, M, N)
    return out2.reshape(M, nb, N).transpose(1, 0, 2)


# ---------------------------------------------------------------------------
# Path 2: general M/N/K-tiled accumulator kernel (with Bt-block fusion).
# ---------------------------------------------------------------------------
def _tiled_kernel_bias(x_ref, w_ref, b_ref, o_ref, acc_ref):
    # x_ref: (Bt, tm, tk), w_ref: (Bt, tk, tn), b_ref: (Bt, 1, tn)
    k = pl.program_id(3)

    @pl.when(k == 0)
    def _init():
        # Fold bias into the accumulator init (no separate epilogue add).
        acc_ref[...] = jnp.broadcast_to(
            b_ref[...].astype(jnp.float32), acc_ref.shape)

    acc_ref[...] += jnp.einsum(
        "bmk,bkn->bmn", x_ref[...], w_ref[...],
        preferred_element_type=jnp.float32)

    @pl.when(k == pl.num_programs(3) - 1)
    def _store():
        o_ref[...] = acc_ref[...].astype(o_ref.dtype)


def _tiled_kernel_nobias(x_ref, w_ref, o_ref, acc_ref):
    k = pl.program_id(3)

    @pl.when(k == 0)
    def _init():
        acc_ref[...] = jnp.zeros_like(acc_ref)

    acc_ref[...] += jnp.einsum(
        "bmk,bkn->bmn", x_ref[...], w_ref[...],
        preferred_element_type=jnp.float32)

    @pl.when(k == pl.num_programs(3) - 1)
    def _store():
        o_ref[...] = acc_ref[...].astype(o_ref.dtype)


def _block_linear_tiled(x, weight, bias):
    nb, M, K = x.shape
    N = weight.shape[2]
    out_dtype = jnp.result_type(x.dtype, weight.dtype)
    itemsize = jnp.dtype(x.dtype).itemsize
    m_align = 8 if itemsize >= 4 else 16      # bf16 packs (16, 128)

    # Balanced tiles; full dim is used whenever it fits one tile (no padding).
    tm, Mp = _pick_tile_m(M, 512, m_align)
    tk, Kp = _pick_tile_kn(K, 2048)
    tn, Np = _pick_tile_kn(N, 512)

    # Fuse several blocks per grid step when a block is a single tile in every
    # dim and the per-step weight DMA would otherwise be tiny.  Target ~2 MiB
    # of weight bytes per step, capped by nb, 32, and a VMEM budget.
    Bt = 1
    if nb > 1 and (tm, tk, tn) == (Mp, Kp, Np):
        w_step = tk * tn * itemsize
        ws = (2 * tm * tk + 2 * tk * tn + 2 * tm * tn + tn) * itemsize \
            + tm * tn * 4
        cap_bt = min(nb, 32,
                     max(1, (2 << 20) // max(w_step, 1)),
                     max(1, (12 << 20) // max(ws, 1)))
        for d in range(cap_bt, 0, -1):
            if nb % d == 0:
                Bt = d
                break

    # Pad only when a dim actually needs alignment padding (rare).
    xp = x if (Mp, Kp) == (M, K) else jnp.pad(
        x, ((0, 0), (0, Mp - M), (0, Kp - K)))
    wp = weight if (Kp, Np) == (K, N) else jnp.pad(
        weight, ((0, 0), (0, Kp - K), (0, Np - N)))

    # Grid order (b, n, m, k): the weight tile index (b, k, n) is constant
    # across the m axis (resident when K fits one k tile); k is the reduction.
    grid = (nb // Bt, Np // tn, Mp // tm, Kp // tk)
    x_spec = pl.BlockSpec((Bt, tm, tk), lambda b, n, m, k: (b, m, k))
    w_spec = pl.BlockSpec((Bt, tk, tn), lambda b, n, m, k: (b, k, n))
    o_spec = pl.BlockSpec((Bt, tm, tn), lambda b, n, m, k: (b, m, n))
    out_shape = jax.ShapeDtypeStruct((nb, Mp, Np), out_dtype)
    scratch = [pltpu.VMEM((Bt, tm, tn), jnp.float32)]

    # VMEM estimate (double-buffered in/out tiles + f32 accumulator, with
    # (8,128)-layout rounding).  Raise the scoped-VMEM limit only when needed
    # (v5e default is 16 MiB; 32 MiB is safe on v5e/v6e/v7x).
    tm_l, tk_l, tn_l = _round_up(tm, 8), _round_up(tk, 128), _round_up(tn, 128)
    est = Bt * ((2 * tm_l * tk_l + 2 * tk_l * tn_l + 2 * tm_l * tn_l
                 + 8 * tn_l) * itemsize + tm_l * tn_l * 4)
    cp_kwargs = dict(
        dimension_semantics=("parallel", "parallel", "parallel", "arbitrary"))
    if est > (12 << 20):
        cp_kwargs["vmem_limit_bytes"] = 32 * 1024 * 1024
    cp = pltpu.CompilerParams(**cp_kwargs)

    if bias is not None:
        bp = bias if Np == N else jnp.pad(bias, ((0, 0), (0, 0), (0, Np - N)))
        b_spec = pl.BlockSpec((Bt, 1, tn), lambda b, n, m, k: (b, 0, n))
        out = pl.pallas_call(
            _tiled_kernel_bias,
            out_shape=out_shape,
            grid_spec=pltpu.PrefetchScalarGridSpec(
                num_scalar_prefetch=0,
                grid=grid,
                in_specs=[x_spec, w_spec, b_spec],
                out_specs=o_spec,
                scratch_shapes=scratch),
            compiler_params=cp,
        )(xp, wp, bp)
    else:
        out = pl.pallas_call(
            _tiled_kernel_nobias,
            out_shape=out_shape,
            grid_spec=pltpu.PrefetchScalarGridSpec(
                num_scalar_prefetch=0,
                grid=grid,
                in_specs=[x_spec, w_spec],
                out_specs=o_spec,
                scratch_shapes=scratch),
            compiler_params=cp,
        )(xp, wp)

    if (Mp, Np) != (M, N):
        out = out[:, :M, :N]
    return out


def block_linear(x, weight, bias=None, cast_to_bf16=False):
    """Pallas TPU implementation of BlockLinear.forward (bmm + optional bias)."""
    nb, M, K = x.shape
    nb_w, Kw, N = weight.shape
    assert nb == nb_w and K == Kw
    if bias is not None:
        assert bias.shape == (nb, 1, N)

    orig_dtype = jnp.result_type(x.dtype, weight.dtype)
    if cast_to_bf16:
        # Optional: halve HBM traffic / use bf16 MXU rates; accumulation stays
        # f32 inside the kernels and the output is cast back to orig_dtype.
        x = x.astype(jnp.bfloat16)
        weight = weight.astype(jnp.bfloat16)
        bias = None if bias is None else bias.astype(jnp.bfloat16)

    # Fused block-diagonal path only when the fused weight is tiny AND x is
    # short (for tall x it does nb x the true FLOPs and becomes MXU bound).
    if nb * K <= 512 and nb * N <= 512 and M <= 256:
        out = _block_linear_fused(x, weight, bias)
    else:
        out = _block_linear_tiled(x, weight, bias)
    return out.astype(orig_dtype) if cast_to_bf16 else out


# ---------------------------------------------------------------------------
# Self-test
# ---------------------------------------------------------------------------
def _rel_err(a, b):
    a = a.astype(jnp.float32)
    b = b.astype(jnp.float32)
    return float(jnp.linalg.norm(a - b) / (jnp.linalg.norm(b) + 1e-30))


if __name__ == "__main__":
    key = jax.random.PRNGKey(0)
    keys = jax.random.split(key, 10)
    TOL = 2e-2  # robust to the TPU's default f32 matmul precision

    # Case 1: BlockLinear(num_blocks=4, in=32, out=32, bias=True), M=8 rows per
    # block -> fused block-diagonal path (one lane-dense matmul, one call).
    nb, M, K, N = 4, 8, 32, 32
    w1 = jax.random.normal(keys[0], (nb, K, N), dtype=jnp.float32)   # torch.randn
    b1 = jnp.zeros((nb, 1, N), dtype=jnp.float32)                    # torch.zeros
    x1 = jax.random.normal(keys[1], (nb, M, K), dtype=jnp.float32)
    out1 = jax.block_until_ready(block_linear(x1, w1, b1))
    ref1 = jnp.einsum("bmk,bkn->bmn", x1, w1,
                      precision=jax.lax.Precision.HIGHEST) + b1
    assert out1.shape == (nb, M, N)
    assert _rel_err(out1, ref1) < TOL

    # Case 2: non-tile-aligned blocks, no bias -> tiled path, full-dim tiles,
    # zero wrapper padding, Bt=2 fusion (single grid step).
    nb2, M2, K2, N2 = 2, 72, 200, 320
    w2 = jax.random.normal(keys[2], (nb2, K2, N2), dtype=jnp.float32)
    x2 = jax.random.normal(keys[3], (nb2, M2, K2), dtype=jnp.float32)
    out2 = jax.block_until_ready(block_linear(x2, w2, None))
    ref2 = jnp.einsum("bmk,bkn->bmn", x2, w2,
                      precision=jax.lax.Precision.HIGHEST)
    assert out2.shape == (nb2, M2, N2)
    assert _rel_err(out2, ref2) < TOL

    # Case 3: many tiny blocks with bias -> tiled path with Bt=16 fusion
    # (all 16 blocks in one grid step).
    nb3, M3, K3, N3 = 16, 8, 64, 64
    w3 = jax.random.normal(keys[4], (nb3, K3, N3), dtype=jnp.float32)
    b3 = jax.random.normal(keys[5], (nb3, 1, N3), dtype=jnp.float32)
    x3 = jax.random.normal(keys[6], (nb3, M3, K3), dtype=jnp.float32)
    out3 = jax.block_until_ready(block_linear(x3, w3, b3))
    ref3 = jnp.einsum("bmk,bkn->bmn", x3, w3,
                      precision=jax.lax.Precision.HIGHEST) + b3
    assert out3.shape == (nb3, M3, N3)
    assert _rel_err(out3, ref3) < TOL

    # Case 4: large K -> balanced K tiling (tk=1280, 2 k-steps) exercising the
    # accumulator init/accumulate/store path with bias.
    nb4, M4, K4, N4 = 1, 320, 2560, 256
    w4 = jax.random.normal(keys[7], (nb4, K4, N4), dtype=jnp.float32)
    b4 = jax.random.normal(keys[8], (nb4, 1, N4), dtype=jnp.float32)
    x4 = jax.random.normal(keys[9], (nb4, M4, K4), dtype=jnp.float32)
    out4 = jax.block_until_ready(block_linear(x4, w4, b4))
    ref4 = jnp.einsum("bmk,bkn->bmn", x4, w4,
                      precision=jax.lax.Precision.HIGHEST) + b4
    assert out4.shape == (nb4, M4, N4)
    assert _rel_err(out4, ref4) < TOL

    print("KERNEL_OK")
</pallas_src>

<mosaic_0001>
module attributes {stable_mosaic.version = 11 : i64} {
  func.func @_fused_kernel_bias(%arg0: memref<8x128xf32, #tpu.memory_space<vmem>>, %arg1: memref<128x128xf32, #tpu.memory_space<vmem>>, %arg2: memref<1x128xf32, #tpu.memory_space<vmem>>, %arg3: memref<8x128xf32, #tpu.memory_space<vmem>>) attributes {dimension_semantics = [], scalar_prefetch = 0 : i64, scratch_operands = 0 : i64, tpu.core_type = #tpu.core_type<tc>} {
    %c0 = arith.constant 0 : index
    %c0_0 = arith.constant 0 : index
    %0 = vector.load %arg0[%c0, %c0_0] : memref<8x128xf32, #tpu.memory_space<vmem>>, vector<8x128xf32>
    %c0_1 = arith.constant 0 : index
    %c0_2 = arith.constant 0 : index
    %1 = vector.load %arg1[%c0_1, %c0_2] : memref<128x128xf32, #tpu.memory_space<vmem>>, vector<128x128xf32>
    %cst = arith.constant dense<0.000000e+00> : vector<8x128xf32>
    %2 = tpu.matmul %0, %1, %cst {dimension_numbers = #tpu.dot_dimension_numbers<[1], [0], [0], [1], [0, 0, 1, 1], [], []>} : vector<8x128xf32>, vector<128x128xf32>, vector<8x128xf32> -> vector<8x128xf32>
    %c0_3 = arith.constant 0 : index
    %c0_4 = arith.constant 0 : index
    %3 = vector.load %arg2[%c0_3, %c0_4] : memref<1x128xf32, #tpu.memory_space<vmem>>, vector<1x128xf32>
    %4 = vector.broadcast %3 : vector<1x128xf32> to vector<8x128xf32>
    %5 = arith.addf %2, %4 : vector<8x128xf32>
    %c0_5 = arith.constant 0 : index
    %c0_6 = arith.constant 0 : index
    %6 = vector.load %arg3[%c0_5, %c0_6] : memref<8x128xf32, #tpu.memory_space<vmem>>, vector<8x128xf32>
    tpu.vector_store %arg3[%c0_5, %c0_6], %5 {strides = array<i32>} : memref<8x128xf32, #tpu.memory_space<vmem>>, vector<8x128xf32>,
    return
  }
}

</mosaic_0001>

<bundles_post_ra>
// kernel: tpu_custom_call.1
= control target key start
LH: loop header
LB: loop body
LE: loop exit
PB: predicated region body
PF: predicated region fallthrough
CT: control target
= control target key end

     0   :  { %8 = vsyncpa [#allocation3], 0  ;;  %s317_s0 = inlined_call_operand.hbm [shape: f32[8,128], index: 0, kind: input, shape index: {}]   ;;  %s318_s1 = inlined_call_operand.hbm [shape: f32[128,128], index: 1, kind: input, shape index: {}]   ;;  %s319_s2 = inlined_call_operand.vmem [shape: f32[1,128], index: 2, kind: input, shape index: {}]   ;;  %s320_s3 = inlined_call_operand.hbm [shape: f32[8,128], index: 3, kind: output, shape index: {}]  }
   0x1   :  { %9 = vsyncpa [#allocation6], 0 }
   0x2   :  { %10 = vsyncpa [#allocation4], 0  ;;  %s278_s12 = smov [#allocation2]   ;;  %s279_s14 = smov [#allocation5]  }
   0x3   :  { %s17_s13 = sshll.u32 %s278_s12, 4  ;;  %s26_s15 = sshll.u32 %s279_s14, 4  ;;  %s18_s13 = int_to_ptr.vmem [resolvable:$true] %s17_s13  ;;  %s27_s15 = int_to_ptr.vmem [resolvable:$true] %s26_s15 }
   0x4   :  { %s220_s16 = scalar_lea.vmem %s18_s13, 128  ;;  %p225_p1 = scmp.lt.s32.totalorder %s18_s13, %s18_s13 }
   0x5   :  { %p221_p0 = scmp.ne.s32.totalorder %s18_s13, %s220_s16  ;;  %p226_p2 = scmp.lt.s32.totalorder %s220_s16, %s220_s16 }
   0x7   :  { %p227_p3 = por %p226_p2, %p225_p1 }
   0x9   :  { %p228_p4 = pnand %p227_p3, %p221_p0 }
   0xb   :  { %231 = shalt.err (!%p228_p4)
}
   0xc   :  { %20 = dma.hbm_to_vmem [thread:$0]  %s317_s0, 128, %s18_s13, [#allocation3]  }
   0xd   :  { %s240_s19 = scalar_lea.vmem %s27_s15, 2048  ;;  %p245_p6 = scmp.lt.s32.totalorder %s27_s15, %s27_s15 }
   0xe   :  { %p241_p5 = scmp.ne.s32.totalorder %s27_s15, %s240_s19  ;;  %p246_p7 = scmp.lt.s32.totalorder %s240_s19, %s240_s19 }
  0x10   :  { %p247_p8 = por %p246_p7, %p245_p6 }
  0x12   :  { %p248_p9 = pnand %p247_p8, %p241_p5 }
  0x14   :  { %251 = shalt.err (!%p248_p9)
}
  0x15   :  { %s280_s20 = smov 128   ;;  %s281_s21 = smov 8  }
  0x16   :  { %32 = dma.hbm_to_vmem [thread:$0]  %s318_s1, 2048, %s27_s15, [#allocation6], %s280_s20, %s280_s20, %s281_s21  }
  0x17   :  { %272 = dma.done.wait [#allocation3], 128  }
  0x18   :  { %273 = vsyncadd [#allocation3], 4294967168 }
  0x19   :  { %274 = dma.done.wait [#allocation6], 2048  }
  0x1a   :  { %275 = vsyncadd [#allocation6], 4294965248  ;;  %v282_v0 = vmov 0.0   ;;  %vm283_vm0 = vmmov 0   ;;  %v57_v1 = vld [vmem:[#allocation5 + $0x78] sm:$0xff]  ;;  %v56_v2 = vld [vmem:[#allocation5 + $0x70] sm:$0xff] }
  0x1b   :  { %170 = vmatprep.subr.mxu0 %v282_v0  ;;  %202 = vmatprep.mubr.msk.f32.mxu0 %vm283_vm0, %v282_v0  ;;  %v55_v3 = vld [vmem:[#allocation5 + $0x68] sm:$0xff]  ;;  %v54_v4 = vld [vmem:[#allocation5 + $0x60] sm:$0xff]  ;;  %v53_v5 = vld [vmem:[#allocation5 + $0x58] sm:$0xff]  ;;  %s284_s24 = smov [#allocation7]  }
  0x1c   :  { %171 = vmatpush3.msra.mxu0 %v57_v1  ;;  %v52_v6 = vld [vmem:[#allocation5 + $0x50] sm:$0xff]  ;;  %v51_v7 = vld [vmem:[#allocation5 + $0x48] sm:$0xff]  ;;  %v50_v8 = vld [vmem:[#allocation5 + $0x40] sm:$0xff]  ;;  %s142_s25 = sshll.u32 %s284_s24, 4  ;;  %s143_s25 = int_to_ptr.vmem [resolvable:$true] %s142_s25 }
  0x1d   :  { %172 = vmatprep.subr.mxu0 %v282_v0  ;;  %v49_v9 = vld [vmem:[#allocation5 + $0x38] sm:$0xff]  ;;  %v48_v10 = vld [vmem:[#allocation5 + $0x30] sm:$0xff]  ;;  %v47_v11 = vld [vmem:[#allocation5 + $0x28] sm:$0xff]  ;;  %s252_s26 = scalar_lea.vmem %s143_s25, 128  ;;  %p257_p11 = scmp.lt.s32.totalorder %s143_s25, %s143_s25 }
  0x1e   :  { %173 = vmatpush3.msra.mxu0 %v56_v2  ;;  %v46_v12 = vld [vmem:[#allocation5 + $0x20] sm:$0xff]  ;;  %v45_v13 = vld [vmem:[#allocation5 + $0x18] sm:$0xff]  ;;  %v44_v14 = vld [vmem:[#allocation5 + $0x10] sm:$0xff]  ;;  %p253_p10 = scmp.ne.s32.totalorder %s143_s25, %s252_s26  ;;  %p258_p12 = scmp.lt.s32.totalorder %s252_s26, %s252_s26 }
  0x1f   :  { %174 = vmatprep.subr.mxu0 %v282_v0  ;;  %v43_v15 = vld [vmem:[#allocation5 + $0x8] sm:$0xff]  ;;  %v42_v16 = vld [vmem:[#allocation5] sm:$0xff]  ;;  %v41_v17 = vld [vmem:[#allocation2] sm:$0xff] }
  0x20   :  { %175 = vmatpush3.msra.mxu0 %v55_v3  ;;  %v152_v18 = vld [vmem:[%s319_s2] ss:$0 sm:$0xff]  ;;  %p259_p13 = por %p258_p12, %p257_p11 }
  0x21   :  { %176 = vmatprep.subr.mxu0 %v282_v0 }
  0x22   :  { %177 = vmatpush3.msra.mxu0 %v54_v4  ;;  %p260_p0 = pnand %p259_p13, %p253_p10 }
  0x23   :  { %178 = vmatprep.subr.mxu0 %v282_v0 }
  0x24   :  { %179 = vmatpush3.msra.mxu0 %v53_v5 }
  0x25   :  { %180 = vmatprep.subr.mxu0 %v282_v0 }
  0x26   :  { %181 = vmatpush3.msra.mxu0 %v52_v6 }
  0x27   :  { %182 = vmatprep.subr.mxu0 %v282_v0 }
  0x28   :  { %183 = vmatpush3.msra.mxu0 %v51_v7 }
  0x29   :  { %184 = vmatprep.subr.mxu0 %v282_v0 }
  0x2a   :  { %185 = vmatpush3.msra.mxu0 %v50_v8 }
  0x2b   :  { %186 = vmatprep.subr.mxu0 %v282_v0 }
  0x2c   :  { %187 = vmatpush3.msra.mxu0 %v49_v9 }
  0x2d   :  { %188 = vmatprep.subr.mxu0 %v282_v0 }
  0x2e   :  { %189 = vmatpush3.msra.mxu0 %v48_v10 }
  0x2f   :  { %190 = vmatprep.subr.mxu0 %v282_v0 }
  0x30   :  { %191 = vmatpush3.msra.mxu0 %v47_v11 }
  0x31   :  { %192 = vmatprep.subr.mxu0 %v282_v0 }
  0x32   :  { %193 = vmatpush3.msra.mxu0 %v46_v12 }
  0x33   :  { %194 = vmatprep.subr.mxu0 %v282_v0 }
  0x34   :  { %195 = vmatpush3.msra.mxu0 %v45_v13 }
  0x35   :  { %196 = vmatprep.subr.mxu0 %v282_v0 }
  0x36   :  { %197 = vmatpush3.msra.mxu0 %v44_v14 }
  0x37   :  { %198 = vmatprep.subr.mxu0 %v282_v0 }
  0x38   :  { %199 = vmatpush3.msra.mxu0 %v43_v15 }
  0x39   :  { %200 = vmatprep.subr.mxu0 %v282_v0 }
  0x3a   :  { %201 = vmatpush3.msra.mxu0 %v42_v16 }
  0x3b   :  { %203 = vmatmul.mubr.f32.vlgmr.msra.gmra.mxu0 %v41_v17 }
  0xfb   :  { %v131_v19 = vpop.f32.mrf.mxu0 }
  0xfc   :  { %v132_v20 = vadd.f32 %v152_v18, %v131_v19 }
  0xfd   :  { %v204_v21 = vpop.f32.mrf.mxu0 }
  0xfe   :  { %135 = vst [vmem:[#allocation7] sm:$0xff] %v132_v20 }
  0xff   :  { %263 = shalt.err (!%p260_p0)
}
 0x100   :  { %145 = dma.vmem_to_hbm [thread:$0]  %s143_s25, 128, %s320_s3, [#allocation4]  }
 0x101   :  { %276 = dma.done.wait [#allocation4], 128  }
 0x102   :  { %277 = vsyncadd [#allocation4], 4294967168 }
 0x103   :  { %149 = vsyncpa [#allocation3], 1 }
 0x104   :  { %150 = vsyncpa [#allocation6], 1 }
 0x105   :  { %151 = vsyncpa [#allocation4], 1 }

</bundles_post_ra>
